<compile_context>
chip_gen: v6e
topology: v6e:2x2x1
jax: 0.10.0
libtpu: 0.0.40
codegen_flags: <defaults>
</compile_context>

<pallas_src>
import numpy as np
import jax
import jax.numpy as jnp
from jax.experimental import pallas as pl
from jax.experimental.pallas import tpu as pltpu

HALF_LOG_2PI = float(0.5 * np.log(2.0 * np.pi))
SIGMA1 = 1.0  # prior std = exp(-0)


def _softplus(x):
    # Numerically stable softplus (log1p(exp(x)) overflows for large x).
    return jnp.maximum(x, 0.0) + jnp.log1p(jnp.exp(-jnp.abs(x)))


# ---------------------------------------------------------------------------
# Fused path: S Monte-Carlo samples folded into the matmul N dimension.
# One grid-free pallas_call; everything resident in VMEM.  Intended for
# small/medium layers (demo regime) where the whole problem fits VMEM.
# ---------------------------------------------------------------------------
def _make_fused_kernel(S, n_out, matmul_dtype):
    def kernel(x_ref, wmu_ref, wsig_ref, weps_ref, bmu_ref, bsig_ref, beps_ref,
               y_ref, kld_ref, w_all, b_all):
        # Sample-invariant params loaded once (sigma precomputed outside).
        wmu = wmu_ref[...]          # (n_in, n_out)  f32
        wsig = wsig_ref[...]        # (n_in, n_out)  f32
        bmu = bmu_ref[...]          # (1, n_out)     f32
        bsig = bsig_ref[...]        # (1, n_out)     f32

        # Build W_all (n_in, S*n_out) / b_all (1, S*n_out) per-sample column
        # blocks with static slices — pure VPU mul/add, no transcendentals.
        for s in range(S):
            cols = slice(s * n_out, (s + 1) * n_out)
            w_eps = weps_ref[:, cols]                    # (n_in, n_out) f32
            b_eps = beps_ref[:, cols]                    # (1, n_out)    f32
            w = wmu + wsig * w_eps                       # f32 sample
            b = bmu + bsig * b_eps
            w_all[:, cols] = w.astype(w_all.dtype)       # bf16 (or f32) operand
            b_all[:, cols] = b
            # Simplified per-sample KLD partial: sum(0.5*(w^2 - eps^2)).
            # (-sum(log sigma) is sample-invariant and added outside.)
            kld_ref[s] = 0.5 * (jnp.sum(w * w - w_eps * w_eps)
                                + jnp.sum(b * b - b_eps * b_eps))

        # One lane-dense MXU matmul over all samples: (B, n_in) @ (n_in, S*n_out)
        x = x_ref[...].astype(matmul_dtype)
        y = jnp.dot(x, w_all[...], preferred_element_type=jnp.float32)
        y_ref[...] = (y + b_all[...]).astype(y_ref.dtype)

    return kernel


def bayesian_linear_forward_mc_fused(x, w_mu_t, w_rho_t, w_eps, b_mu, b_rho,
                                     b_eps, matmul_dtype=jnp.bfloat16):
    """S-sample forward, S folded into the matmul N dimension.

    Shapes (weights pre-transposed to the MXU-friendly (n_in, n_out) layout):
      x       : (B, n_in)
      w_mu_t  : (n_in, n_out)        w_rho_t : (n_in, n_out)
      w_eps   : (n_in, S, n_out)     -- drawn directly in this layout so the
                                        reshape to (n_in, S*n_out) is free
      b_mu    : (n_out,)             b_rho   : (n_out,)
      b_eps   : (S, n_out)
    Returns y: (S, B, n_out), kld: (S,)
    """
    B, n_in = x.shape
    n_in2, S, n_out = w_eps.shape
    assert n_in2 == n_in and b_eps.shape == (S, n_out)

    # ---- hoisted, sample-invariant transcendentals (outside the kernel) ----
    w_sigma = _softplus(w_rho_t)                         # (n_in, n_out)
    b_sigma = _softplus(b_rho)                           # (n_out,)
    kld_const = -(jnp.sum(jnp.log(w_sigma)) + jnp.sum(jnp.log(b_sigma)))

    w_eps_2d = w_eps.reshape(n_in, S * n_out)            # trailing-dims merge: free
    b_eps_2d = b_eps.reshape(1, S * n_out)
    b_mu_2d = b_mu.reshape(1, n_out)
    b_sigma_2d = b_sigma.reshape(1, n_out)

    kernel = _make_fused_kernel(S, n_out, matmul_dtype)
    y2d, kld_part = pl.pallas_call(
        kernel,
        out_shape=(jax.ShapeDtypeStruct((B, S * n_out), x.dtype),
                   jax.ShapeDtypeStruct((S,), jnp.float32)),
        in_specs=[pl.BlockSpec(memory_space=pltpu.MemorySpace.VMEM)] * 7,
        out_specs=(pl.BlockSpec(memory_space=pltpu.MemorySpace.VMEM),
                   pl.BlockSpec(memory_space=pltpu.MemorySpace.SMEM)),
        scratch_shapes=[pltpu.VMEM((n_in, S * n_out), matmul_dtype),   # W_all
                        pltpu.VMEM((1, S * n_out), jnp.float32)],      # b_all
    )(x, w_mu_t, w_sigma, w_eps_2d, b_mu_2d, b_sigma_2d, b_eps_2d)

    y = y2d.reshape(B, S, n_out).transpose(1, 0, 2)      # presentation only
    return y, kld_part + kld_const


def bayesian_linear_forward(x, w_mu_t, w_rho_t, w_eps, b_mu, b_rho, b_eps,
                            matmul_dtype=jnp.float32):
    """Single-sample forward matching BayesianLinearLayer.forward / .kld.
    w_eps: (n_in, n_out), b_eps: (n_out,)."""
    y, kld = bayesian_linear_forward_mc_fused(
        x, w_mu_t, w_rho_t, w_eps[:, None, :], b_mu, b_rho, b_eps[None],
        matmul_dtype=matmul_dtype)
    return y[0], kld[0]


# ---------------------------------------------------------------------------
# Tiled path: grid=(S, n_out//TN) with lane-dense TN (multiple of 128).
# Scales to real layer sizes; per-sample KLD accumulated across N-tiles in a
# resident SMEM output block.  Choose TN so that the resident working set
#   (B*n_in + 2*3*n_in*TN + 2*B*TN) * bytes  stays well under ~48 MiB on v7x.
# ---------------------------------------------------------------------------
def _make_tiled_kernel(matmul_dtype):
    def kernel(x_ref, wmu_ref, wsig_ref, weps_ref, bmu_ref, bsig_ref, beps_ref,
               y_ref, kld_ref):
        j = pl.program_id(1)                         # N-tile index (reduction for kld)
        w_eps = weps_ref[0]                          # (n_in, TN) f32
        b_eps = beps_ref[0]                          # (1, TN)    f32

        w = wmu_ref[...] + wsig_ref[...] * w_eps     # f32 sample (no transcendentals)
        b = bmu_ref[...] + bsig_ref[...] * b_eps

        part = 0.5 * (jnp.sum(w * w - w_eps * w_eps)
                      + jnp.sum(b * b - b_eps * b_eps))

        @pl.when(j == 0)
        def _():
            kld_ref[0] = part

        @pl.when(j > 0)
        def _():
            kld_ref[0] = kld_ref[0] + part

        x = x_ref[...].astype(matmul_dtype)
        y = jnp.dot(x, w.astype(matmul_dtype), preferred_element_type=jnp.float32)
        y_ref[0] = (y + b).astype(y_ref.dtype)

    return kernel


def bayesian_linear_forward_mc_tiled(x, w_mu_t, w_rho_t, w_eps, b_mu, b_rho,
                                     b_eps, tn=128, matmul_dtype=jnp.bfloat16,
                                     vmem_limit_bytes=None):
    """S-sample forward tiled over the output dimension.

    Shapes:
      x      : (B, n_in)
      w_mu_t : (n_in, n_out)        w_rho_t : (n_in, n_out)
      w_eps  : (S, n_in, n_out)
      b_mu   : (n_out,)             b_rho   : (n_out,)
      b_eps  : (S, n_out)
    Returns y: (S, B, n_out), kld: (S,)
    """
    B, n_in = x.shape
    S, n_in2, n_out = w_eps.shape
    assert n_in2 == n_in and n_out % tn == 0
    J = n_out // tn

    # ---- hoisted, sample-invariant transcendentals (outside the kernel) ----
    w_sigma = _softplus(w_rho_t)
    b_sigma = _softplus(b_rho)
    kld_const = -(jnp.sum(jnp.log(w_sigma)) + jnp.sum(jnp.log(b_sigma)))

    b_mu_2d = b_mu.reshape(1, n_out)
    b_sigma_2d = b_sigma.reshape(1, n_out)
    b_eps_3d = b_eps.reshape(S, 1, n_out)

    in_specs = [
        pl.BlockSpec((B, n_in), lambda s, j: (0, 0)),          # x (shared, resident)
        pl.BlockSpec((n_in, tn), lambda s, j: (0, j)),         # w_mu tile
        pl.BlockSpec((n_in, tn), lambda s, j: (0, j)),         # w_sigma tile
        pl.BlockSpec((1, n_in, tn), lambda s, j: (s, 0, j)),   # w_eps per (s, tile)
        pl.BlockSpec((1, tn), lambda s, j: (0, j)),            # b_mu tile
        pl.BlockSpec((1, tn), lambda s, j: (0, j)),            # b_sigma tile
        pl.BlockSpec((1, 1, tn), lambda s, j: (s, 0, j)),      # b_eps per (s, tile)
    ]
    out_specs = (
        pl.BlockSpec((1, B, tn), lambda s, j: (s, 0, j)),      # y tile (lane-dense)
        pl.BlockSpec((1,), lambda s, j: (s,),                  # kld acc over j, SMEM
                     memory_space=pltpu.MemorySpace.SMEM),
    )
    cp = dict(dimension_semantics=("parallel", "arbitrary"))   # s parallel, j reduce
    if vmem_limit_bytes is not None:
        cp["vmem_limit_bytes"] = vmem_limit_bytes

    y, kld_part = pl.pallas_call(
        _make_tiled_kernel(matmul_dtype),
        grid=(S, J),
        in_specs=in_specs,
        out_specs=out_specs,
        out_shape=(jax.ShapeDtypeStruct((S, B, n_out), x.dtype),
                   jax.ShapeDtypeStruct((S,), jnp.float32)),
        compiler_params=pltpu.CompilerParams(**cp),
    )(x, w_mu_t, w_sigma, w_eps, b_mu_2d, b_sigma_2d, b_eps_3d)

    return y, kld_part + kld_const


# ---------------------------------------------------------------------------
# Pure-JAX reference (original, unsimplified torch form).
# ---------------------------------------------------------------------------
def _reference(x, w_mu_t, w_rho_t, w_eps_sio, b_mu, b_rho, b_eps, matmul_dtype):
    w_sig = _softplus(w_rho_t)
    b_sig = _softplus(b_rho)
    w_s = w_mu_t[None] + w_sig[None] * w_eps_sio                 # (S, n_in, n_out)
    b_s = b_mu[None] + b_sig[None] * b_eps                       # (S, n_out)
    y = jnp.einsum('bi,sio->sbo', x.astype(matmul_dtype), w_s.astype(matmul_dtype),
                   preferred_element_type=jnp.float32) + b_s[:, None, :]

    def log_normal_sum(v, mu, sigma, axes):
        return jnp.sum(-HALF_LOG_2PI - jnp.log(sigma)
                       - (v - mu) ** 2 / (2.0 * sigma ** 2), axis=axes)

    log_q = (log_normal_sum(w_s, w_mu_t[None], w_sig[None], (1, 2))
             + log_normal_sum(b_s, b_mu[None], b_sig[None], (1,)))
    log_p = (log_normal_sum(w_s, 0.0, jnp.float32(SIGMA1), (1, 2))
             + log_normal_sum(b_s, 0.0, jnp.float32(SIGMA1), (1,)))
    return y, log_q - log_p


if __name__ == "__main__":
    key = jax.random.PRNGKey(0)
    ks = jax.random.split(key, 14)

    # ======== demo 1: fused path (S folded into lanes, S*n_out = 128) ========
    B, n_in, n_out, S = 8, 32, 32, 4
    x = jax.random.normal(ks[0], (B, n_in), dtype=jnp.float32)
    w_mu = jax.random.uniform(ks[1], (n_out, n_in), minval=-0.2, maxval=0.2,
                              dtype=jnp.float32)
    w_rho = jax.random.uniform(ks[2], (n_out, n_in), minval=-5.0, maxval=-4.0,
                               dtype=jnp.float32)
    b_mu = jax.random.uniform(ks[3], (n_out,), minval=-0.2, maxval=0.2,
                              dtype=jnp.float32)
    b_rho = jax.random.uniform(ks[4], (n_out,), minval=-5.0, maxval=-4.0,
                               dtype=jnp.float32)
    w_mu_t, w_rho_t = w_mu.T, w_rho.T                         # (n_in, n_out)
    w_eps = jax.random.normal(ks[5], (n_in, S, n_out), dtype=jnp.float32)
    b_eps = jax.random.normal(ks[6], (S, n_out), dtype=jnp.float32)
    w_eps_sio = jnp.transpose(w_eps, (1, 0, 2))               # (S, n_in, n_out)

    # f32 matmul run: exact module semantics, tight check.
    y32, k32 = bayesian_linear_forward_mc_fused(
        x, w_mu_t, w_rho_t, w_eps, b_mu, b_rho, b_eps, matmul_dtype=jnp.float32)
    yr32, kr = _reference(x, w_mu_t, w_rho_t, w_eps_sio, b_mu, b_rho, b_eps,
                          jnp.float32)
    jax.block_until_ready((y32, k32))
    np.testing.assert_allclose(np.asarray(y32), np.asarray(yr32),
                               rtol=1e-4, atol=2e-4)
    np.testing.assert_allclose(np.asarray(k32), np.asarray(kr),
                               rtol=2e-4, atol=1e-2)

    # bf16-operand matmul run (default perf path); reference with matching casts.
    ybf, kbf = bayesian_linear_forward_mc_fused(
        x, w_mu_t, w_rho_t, w_eps, b_mu, b_rho, b_eps, matmul_dtype=jnp.bfloat16)
    yrbf, _ = _reference(x, w_mu_t, w_rho_t, w_eps_sio, b_mu, b_rho, b_eps,
                         jnp.bfloat16)
    jax.block_until_ready((ybf, kbf))
    np.testing.assert_allclose(np.asarray(ybf), np.asarray(yrbf),
                               rtol=1e-2, atol=1e-2)
    np.testing.assert_allclose(np.asarray(kbf), np.asarray(kr),
                               rtol=2e-4, atol=1e-2)

    # Module-equivalent single-sample interface.
    y1, k1 = bayesian_linear_forward(x, w_mu_t, w_rho_t, w_eps[:, 0, :],
                                     b_mu, b_rho, b_eps[0],
                                     matmul_dtype=jnp.float32)
    jax.block_until_ready((y1, k1))
    np.testing.assert_allclose(np.asarray(y1), np.asarray(yr32[0]),
                               rtol=1e-4, atol=2e-4)
    np.testing.assert_allclose(np.asarray(k1), np.asarray(kr[0]),
                               rtol=2e-4, atol=1e-2)

    # ======== demo 2: tiled path (lane-dense TN=128 output tiles) ========
    B2, n_in2, n_out2, S2, TN = 16, 128, 256, 2, 128
    x2 = jax.random.normal(ks[7], (B2, n_in2), dtype=jnp.float32)
    w_mu2_t = jax.random.uniform(ks[8], (n_in2, n_out2), minval=-0.2, maxval=0.2,
                                 dtype=jnp.float32)
    w_rho2_t = jax.random.uniform(ks[9], (n_in2, n_out2), minval=-5.0, maxval=-4.0,
                                  dtype=jnp.float32)
    b_mu2 = jax.random.uniform(ks[10], (n_out2,), minval=-0.2, maxval=0.2,
                               dtype=jnp.float32)
    b_rho2 = jax.random.uniform(ks[11], (n_out2,), minval=-5.0, maxval=-4.0,
                                dtype=jnp.float32)
    w_eps2 = jax.random.normal(ks[12], (S2, n_in2, n_out2), dtype=jnp.float32)
    b_eps2 = jax.random.normal(ks[13], (S2, n_out2), dtype=jnp.float32)

    y_t, k_t = bayesian_linear_forward_mc_tiled(
        x2, w_mu2_t, w_rho2_t, w_eps2, b_mu2, b_rho2, b_eps2,
        tn=TN, matmul_dtype=jnp.bfloat16)
    yr_t, kr_t = _reference(x2, w_mu2_t, w_rho2_t, w_eps2, b_mu2, b_rho2, b_eps2,
                            jnp.bfloat16)
    jax.block_until_ready((y_t, k_t))
    assert y_t.shape == (S2, B2, n_out2) and k_t.shape == (S2,)
    np.testing.assert_allclose(np.asarray(y_t), np.asarray(yr_t),
                               rtol=1e-2, atol=1e-2)
    np.testing.assert_allclose(np.asarray(k_t), np.asarray(kr_t),
                               rtol=2e-4, atol=0.5)

    print("KERNEL_OK")
</pallas_src>

<mosaic_0001>
module attributes {stable_mosaic.version = 11 : i64} {
  func.func @kernel(%arg0: memref<8x32xf32, #tpu.memory_space<vmem>>, %arg1: memref<32x32xf32, #tpu.memory_space<vmem>>, %arg2: memref<32x32xf32, #tpu.memory_space<vmem>>, %arg3: memref<32x128xf32, #tpu.memory_space<vmem>>, %arg4: memref<1x32xf32, #tpu.memory_space<vmem>>, %arg5: memref<1x32xf32, #tpu.memory_space<vmem>>, %arg6: memref<1x128xf32, #tpu.memory_space<vmem>>, %arg7: memref<8x128xf32, #tpu.memory_space<vmem>>, %arg8: memref<4xf32, #tpu.memory_space<smem>>, %arg9: memref<32x128xf32, #tpu.memory_space<vmem>>, %arg10: memref<1x128xf32, #tpu.memory_space<vmem>>) attributes {dimension_semantics = [], scalar_prefetch = 0 : i64, scratch_operands = 2 : i64, tpu.core_type = #tpu.core_type<tc>} {
    %c0 = arith.constant 0 : index
    %c0_0 = arith.constant 0 : index
    %0 = vector.load %arg1[%c0, %c0_0] : memref<32x32xf32, #tpu.memory_space<vmem>>, vector<32x32xf32>
    %c0_1 = arith.constant 0 : index
    %c0_2 = arith.constant 0 : index
    %1 = vector.load %arg2[%c0_1, %c0_2] : memref<32x32xf32, #tpu.memory_space<vmem>>, vector<32x32xf32>
    %c0_3 = arith.constant 0 : index
    %c0_4 = arith.constant 0 : index
    %2 = vector.load %arg4[%c0_3, %c0_4] : memref<1x32xf32, #tpu.memory_space<vmem>>, vector<1x32xf32>
    %c0_5 = arith.constant 0 : index
    %c0_6 = arith.constant 0 : index
    %3 = vector.load %arg5[%c0_5, %c0_6] : memref<1x32xf32, #tpu.memory_space<vmem>>, vector<1x32xf32>
    %c0_7 = arith.constant 0 : index
    %c0_8 = arith.constant 0 : index
    %4 = vector.load %arg3[%c0_7, %c0_8] : memref<32x128xf32, #tpu.memory_space<vmem>>, vector<32x32xf32>
    %c0_9 = arith.constant 0 : index
    %c0_10 = arith.constant 0 : index
    %5 = vector.load %arg6[%c0_9, %c0_10] : memref<1x128xf32, #tpu.memory_space<vmem>>, vector<1x32xf32>
    %6 = arith.mulf %1, %4 : vector<32x32xf32>
    %7 = arith.addf %0, %6 : vector<32x32xf32>
    %8 = arith.mulf %3, %5 : vector<1x32xf32>
    %9 = arith.addf %2, %8 : vector<1x32xf32>
    %c0_11 = arith.constant 0 : index
    %c0_12 = arith.constant 0 : index
    %10 = vector.load %arg9[%c0_11, %c0_12] : memref<32x128xf32, #tpu.memory_space<vmem>>, vector<32x32xf32>
    tpu.vector_store %arg9[%c0_11, %c0_12], %7 {strides = array<i32>} : memref<32x128xf32, #tpu.memory_space<vmem>>, vector<32x32xf32>,
    %c0_13 = arith.constant 0 : index
    %c0_14 = arith.constant 0 : index
    %11 = vector.load %arg10[%c0_13, %c0_14] : memref<1x128xf32, #tpu.memory_space<vmem>>, vector<1x32xf32>
    tpu.vector_store %arg10[%c0_13, %c0_14], %9 {strides = array<i32>} : memref<1x128xf32, #tpu.memory_space<vmem>>, vector<1x32xf32>,
    %12 = arith.mulf %7, %7 : vector<32x32xf32>
    %13 = arith.mulf %4, %4 : vector<32x32xf32>
    %14 = arith.subf %12, %13 : vector<32x32xf32>
    %15 = vector.shape_cast %14 : vector<32x32xf32> to vector<1x32x32xf32>
    %cst = arith.constant dense<0.000000e+00> : vector<1xf32>
    %16 = vector.multi_reduction <add>, %15, %cst [1, 2] : vector<1x32x32xf32> to vector<1xf32>
    %17 = vector.shape_cast %16 : vector<1xf32> to vector<1x1x1xf32>
    %18 = vector.extract %17[0, 0, 0] : f32 from vector<1x1x1xf32>
    %19 = arith.mulf %9, %9 : vector<1x32xf32>
    %20 = arith.mulf %5, %5 : vector<1x32xf32>
    %21 = arith.subf %19, %20 : vector<1x32xf32>
    %22 = vector.shape_cast %21 : vector<1x32xf32> to vector<1x1x32xf32>
    %cst_15 = arith.constant dense<0.000000e+00> : vector<1xf32>
    %23 = vector.multi_reduction <add>, %22, %cst_15 [1, 2] : vector<1x1x32xf32> to vector<1xf32>
    %24 = vector.shape_cast %23 : vector<1xf32> to vector<1x1x1xf32>
    %25 = vector.extract %24[0, 0, 0] : f32 from vector<1x1x1xf32>
    %26 = arith.addf %18, %25 : f32
    %cst_16 = arith.constant 5.000000e-01 : f32
    %27 = arith.mulf %cst_16, %26 : f32
    %c0_17 = arith.constant 0 : index
    %28 = memref.load %arg8[%c0_17] : memref<4xf32, #tpu.memory_space<smem>>
    memref.store %27, %arg8[%c0_17] : memref<4xf32, #tpu.memory_space<smem>>
    %c0_18 = arith.constant 0 : index
    %c32 = arith.constant 32 : index
    %29 = vector.load %arg3[%c0_18, %c32] : memref<32x128xf32, #tpu.memory_space<vmem>>, vector<32x32xf32>
    %c0_19 = arith.constant 0 : index
    %c32_20 = arith.constant 32 : index
    %30 = vector.load %arg6[%c0_19, %c32_20] : memref<1x128xf32, #tpu.memory_space<vmem>>, vector<1x32xf32>
    %31 = arith.mulf %1, %29 : vector<32x32xf32>
    %32 = arith.addf %0, %31 : vector<32x32xf32>
    %33 = arith.mulf %3, %30 : vector<1x32xf32>
    %34 = arith.addf %2, %33 : vector<1x32xf32>
    %c0_21 = arith.constant 0 : index
    %c32_22 = arith.constant 32 : index
    %35 = vector.load %arg9[%c0_21, %c32_22] : memref<32x128xf32, #tpu.memory_space<vmem>>, vector<32x32xf32>
    tpu.vector_store %arg9[%c0_21, %c32_22], %32 {strides = array<i32>} : memref<32x128xf32, #tpu.memory_space<vmem>>, vector<32x32xf32>,
    %c0_23 = arith.constant 0 : index
    %c32_24 = arith.constant 32 : index
    %36 = vector.load %arg10[%c0_23, %c32_24] : memref<1x128xf32, #tpu.memory_space<vmem>>, vector<1x32xf32>
    tpu.vector_store %arg10[%c0_23, %c32_24], %34 {strides = array<i32>} : memref<1x128xf32, #tpu.memory_space<vmem>>, vector<1x32xf32>,
    %37 = arith.mulf %32, %32 : vector<32x32xf32>
    %38 = arith.mulf %29, %29 : vector<32x32xf32>
    %39 = arith.subf %37, %38 : vector<32x32xf32>
    %40 = vector.shape_cast %39 : vector<32x32xf32> to vector<1x32x32xf32>
    %cst_25 = arith.constant dense<0.000000e+00> : vector<1xf32>
    %41 = vector.multi_reduction <add>, %40, %cst_25 [1, 2] : vector<1x32x32xf32> to vector<1xf32>
    %42 = vector.shape_cast %41 : vector<1xf32> to vector<1x1x1xf32>
    %43 = vector.extract %42[0, 0, 0] : f32 from vector<1x1x1xf32>
    %44 = arith.mulf %34, %34 : vector<1x32xf32>
    %45 = arith.mulf %30, %30 : vector<1x32xf32>
    %46 = arith.subf %44, %45 : vector<1x32xf32>
    %47 = vector.shape_cast %46 : vector<1x32xf32> to vector<1x1x32xf32>
    %cst_26 = arith.constant dense<0.000000e+00> : vector<1xf32>
    %48 = vector.multi_reduction <add>, %47, %cst_26 [1, 2] : vector<1x1x32xf32> to vector<1xf32>
    %49 = vector.shape_cast %48 : vector<1xf32> to vector<1x1x1xf32>
    %50 = vector.extract %49[0, 0, 0] : f32 from vector<1x1x1xf32>
    %51 = arith.addf %43, %50 : f32
    %cst_27 = arith.constant 5.000000e-01 : f32
    %52 = arith.mulf %cst_27, %51 : f32
    %c1 = arith.constant 1 : index
    %53 = memref.load %arg8[%c1] : memref<4xf32, #tpu.memory_space<smem>>
    memref.store %52, %arg8[%c1] : memref<4xf32, #tpu.memory_space<smem>>
    %c0_28 = arith.constant 0 : index
    %c64 = arith.constant 64 : index
    %54 = vector.load %arg3[%c0_28, %c64] : memref<32x128xf32, #tpu.memory_space<vmem>>, vector<32x32xf32>
    %c0_29 = arith.constant 0 : index
    %c64_30 = arith.constant 64 : index
    %55 = vector.load %arg6[%c0_29, %c64_30] : memref<1x128xf32, #tpu.memory_space<vmem>>, vector<1x32xf32>
    %56 = arith.mulf %1, %54 : vector<32x32xf32>
    %57 = arith.addf %0, %56 : vector<32x32xf32>
    %58 = arith.mulf %3, %55 : vector<1x32xf32>
    %59 = arith.addf %2, %58 : vector<1x32xf32>
    %c0_31 = arith.constant 0 : index
    %c64_32 = arith.constant 64 : index
    %60 = vector.load %arg9[%c0_31, %c64_32] : memref<32x128xf32, #tpu.memory_space<vmem>>, vector<32x32xf32>
    tpu.vector_store %arg9[%c0_31, %c64_32], %57 {strides = array<i32>} : memref<32x128xf32, #tpu.memory_space<vmem>>, vector<32x32xf32>,
    %c0_33 = arith.constant 0 : index
    %c64_34 = arith.constant 64 : index
    %61 = vector.load %arg10[%c0_33, %c64_34] : memref<1x128xf32, #tpu.memory_space<vmem>>, vector<1x32xf32>
    tpu.vector_store %arg10[%c0_33, %c64_34], %59 {strides = array<i32>} : memref<1x128xf32, #tpu.memory_space<vmem>>, vector<1x32xf32>,
    %62 = arith.mulf %57, %57 : vector<32x32xf32>
    %63 = arith.mulf %54, %54 : vector<32x32xf32>
    %64 = arith.subf %62, %63 : vector<32x32xf32>
    %65 = vector.shape_cast %64 : vector<32x32xf32> to vector<1x32x32xf32>
    %cst_35 = arith.constant dense<0.000000e+00> : vector<1xf32>
    %66 = vector.multi_reduction <add>, %65, %cst_35 [1, 2] : vector<1x32x32xf32> to vector<1xf32>
    %67 = vector.shape_cast %66 : vector<1xf32> to vector<1x1x1xf32>
    %68 = vector.extract %67[0, 0, 0] : f32 from vector<1x1x1xf32>
    %69 = arith.mulf %59, %59 : vector<1x32xf32>
    %70 = arith.mulf %55, %55 : vector<1x32xf32>
    %71 = arith.subf %69, %70 : vector<1x32xf32>
    %72 = vector.shape_cast %71 : vector<1x32xf32> to vector<1x1x32xf32>
    %cst_36 = arith.constant dense<0.000000e+00> : vector<1xf32>
    %73 = vector.multi_reduction <add>, %72, %cst_36 [1, 2] : vector<1x1x32xf32> to vector<1xf32>
    %74 = vector.shape_cast %73 : vector<1xf32> to vector<1x1x1xf32>
    %75 = vector.extract %74[0, 0, 0] : f32 from vector<1x1x1xf32>
    %76 = arith.addf %68, %75 : f32
    %cst_37 = arith.constant 5.000000e-01 : f32
    %77 = arith.mulf %cst_37, %76 : f32
    %c2 = arith.constant 2 : index
    %78 = memref.load %arg8[%c2] : memref<4xf32, #tpu.memory_space<smem>>
    memref.store %77, %arg8[%c2] : memref<4xf32, #tpu.memory_space<smem>>
    %c0_38 = arith.constant 0 : index
    %c96 = arith.constant 96 : index
    %79 = vector.load %arg3[%c0_38, %c96] : memref<32x128xf32, #tpu.memory_space<vmem>>, vector<32x32xf32>
    %c0_39 = arith.constant 0 : index
    %c96_40 = arith.constant 96 : index
    %80 = vector.load %arg6[%c0_39, %c96_40] : memref<1x128xf32, #tpu.memory_space<vmem>>, vector<1x32xf32>
    %81 = arith.mulf %1, %79 : vector<32x32xf32>
    %82 = arith.addf %0, %81 : vector<32x32xf32>
    %83 = arith.mulf %3, %80 : vector<1x32xf32>
    %84 = arith.addf %2, %83 : vector<1x32xf32>
    %c0_41 = arith.constant 0 : index
    %c96_42 = arith.constant 96 : index
    %85 = vector.load %arg9[%c0_41, %c96_42] : memref<32x128xf32, #tpu.memory_space<vmem>>, vector<32x32xf32>
    tpu.vector_store %arg9[%c0_41, %c96_42], %82 {strides = array<i32>} : memref<32x128xf32, #tpu.memory_space<vmem>>, vector<32x32xf32>,
    %c0_43 = arith.constant 0 : index
    %c96_44 = arith.constant 96 : index
    %86 = vector.load %arg10[%c0_43, %c96_44] : memref<1x128xf32, #tpu.memory_space<vmem>>, vector<1x32xf32>
    tpu.vector_store %arg10[%c0_43, %c96_44], %84 {strides = array<i32>} : memref<1x128xf32, #tpu.memory_space<vmem>>, vector<1x32xf32>,
    %87 = arith.mulf %82, %82 : vector<32x32xf32>
    %88 = arith.mulf %79, %79 : vector<32x32xf32>
    %89 = arith.subf %87, %88 : vector<32x32xf32>
    %90 = vector.shape_cast %89 : vector<32x32xf32> to vector<1x32x32xf32>
    %cst_45 = arith.constant dense<0.000000e+00> : vector<1xf32>
    %91 = vector.multi_reduction <add>, %90, %cst_45 [1, 2] : vector<1x32x32xf32> to vector<1xf32>
    %92 = vector.shape_cast %91 : vector<1xf32> to vector<1x1x1xf32>
    %93 = vector.extract %92[0, 0, 0] : f32 from vector<1x1x1xf32>
    %94 = arith.mulf %84, %84 : vector<1x32xf32>
    %95 = arith.mulf %80, %80 : vector<1x32xf32>
    %96 = arith.subf %94, %95 : vector<1x32xf32>
    %97 = vector.shape_cast %96 : vector<1x32xf32> to vector<1x1x32xf32>
    %cst_46 = arith.constant dense<0.000000e+00> : vector<1xf32>
    %98 = vector.multi_reduction <add>, %97, %cst_46 [1, 2] : vector<1x1x32xf32> to vector<1xf32>
    %99 = vector.shape_cast %98 : vector<1xf32> to vector<1x1x1xf32>
    %100 = vector.extract %99[0, 0, 0] : f32 from vector<1x1x1xf32>
    %101 = arith.addf %93, %100 : f32
    %cst_47 = arith.constant 5.000000e-01 : f32
    %102 = arith.mulf %cst_47, %101 : f32
    %c3 = arith.constant 3 : index
    %103 = memref.load %arg8[%c3] : memref<4xf32, #tpu.memory_space<smem>>
    memref.store %102, %arg8[%c3] : memref<4xf32, #tpu.memory_space<smem>>
    %c0_48 = arith.constant 0 : index
    %c0_49 = arith.constant 0 : index
    %104 = vector.load %arg0[%c0_48, %c0_49] : memref<8x32xf32, #tpu.memory_space<vmem>>, vector<8x32xf32>
    %c0_50 = arith.constant 0 : index
    %c0_51 = arith.constant 0 : index
    %105 = vector.load %arg9[%c0_50, %c0_51] : memref<32x128xf32, #tpu.memory_space<vmem>>, vector<32x128xf32>
    %cst_52 = arith.constant dense<0.000000e+00> : vector<8x128xf32>
    %106 = tpu.matmul %104, %105, %cst_52 {dimension_numbers = #tpu.dot_dimension_numbers<[1], [0], [0], [1], [0, 0, 1, 1], [], []>} : vector<8x32xf32>, vector<32x128xf32>, vector<8x128xf32> -> vector<8x128xf32>
    %c0_53 = arith.constant 0 : index
    %c0_54 = arith.constant 0 : index
    %107 = vector.load %arg10[%c0_53, %c0_54] : memref<1x128xf32, #tpu.memory_space<vmem>>, vector<1x128xf32>
    %108 = vector.broadcast %107 : vector<1x128xf32> to vector<8x128xf32>
    %109 = arith.addf %106, %108 : vector<8x128xf32>
    %c0_55 = arith.constant 0 : index
    %c0_56 = arith.constant 0 : index
    %110 = vector.load %arg7[%c0_55, %c0_56] : memref<8x128xf32, #tpu.memory_space<vmem>>, vector<8x128xf32>
    tpu.vector_store %arg7[%c0_55, %c0_56], %109 {strides = array<i32>} : memref<8x128xf32, #tpu.memory_space<vmem>>, vector<8x128xf32>,
    return
  }
}

</mosaic_0001>

<bundles_post_ra>
// kernel: tpu_custom_call.1
= control target key start
LH: loop header
LB: loop body
LE: loop exit
PB: predicated region body
PF: predicated region fallthrough
CT: control target
= control target key end

     0   :  { %14 = vsyncpa [#allocation5], 0  ;;  %s1179_s0 = inlined_call_operand.hbm [shape: f32[8,32], index: 0, kind: input, shape index: {}]   ;;  %s1180_s1 = inlined_call_operand.hbm [shape: f32[32,32], index: 1, kind: input, shape index: {}]   ;;  %s1181_s2 = inlined_call_operand.hbm [shape: f32[32,32], index: 2, kind: input, shape index: {}]   ;;  %s1182_s3 = inlined_call_operand.hbm [shape: f32[32,128], index: 3, kind: input, shape index: {}]   ;;  %s1183_s4 = inlined_call_operand.vmem [shape: f32[1,32], index: 4, kind: input, shape index: {}]   ;;  %s1184_s5 = inlined_call_operand.vmem [shape: f32[1,32], index: 5, kind: input, shape index: {}]   ;;  %s1185_s6 = inlined_call_operand.vmem [shape: f32[1,128], index: 6, kind: input, shape index: {}]   ;;  %s1186_s7 = inlined_call_operand.hbm [shape: f32[8,128], index: 7, kind: output, shape index: {0}]   ;;  %s1187_s8 = inlined_call_operand.hbm [shape: f32[4], index: 8, kind: output, shape index: {1}]  }
   0x1   :  { %15 = vsyncpa [#allocation9], 0 }
   0x2   :  { %16 = vsyncpa [#allocation12], 0 }
   0x3   :  { %17 = vsyncpa [#allocation6], 0 }
   0x4   :  { %18 = vsyncpa [#allocation7], 0  ;;  %s834_s27 = smov [#allocation8]  }
   0x5   :  { %s34_s28 = sshll.u32 %s834_s27, 4  ;;  %s35_s28 = int_to_ptr.vmem [resolvable:$true] %s34_s28 }
   0x6   :  { %s724_s29 = scalar_lea.vmem %s35_s28, 512  ;;  %p729_p1 = scmp.lt.s32.totalorder %s35_s28, %s35_s28 }
   0x7   :  { %p725_p0 = scmp.ne.s32.totalorder %s35_s28, %s724_s29  ;;  %p730_p2 = scmp.lt.s32.totalorder %s724_s29, %s724_s29 }
   0x9   :  { %p731_p3 = por %p730_p2, %p729_p1 }
   0xb   :  { %p732_p4 = pnand %p731_p3, %p725_p0 }
   0xd   :  { %735 = shalt.err (!%p732_p4)
}
   0xe   :  { %s835_s30 = smov 128   ;;  %s836_s9 = smov 8  }
   0xf   :  { %40 = dma.hbm_to_vmem [thread:$0]  %s1180_s1, 512, %s35_s28, [#allocation9], %s835_s30, %s835_s30, %s836_s9  }
  0x10   :  { %s837_s12 = smov [#allocation4]   ;;  %s838_s14 = smov [#allocation10]  }
  0x11   :  { %s25_s13 = sshll.u32 %s837_s12, 4  ;;  %s46_s15 = sshll.u32 %s838_s14, 4  ;;  %s26_s13 = int_to_ptr.vmem [resolvable:$true] %s25_s13  ;;  %s47_s15 = int_to_ptr.vmem [resolvable:$true] %s46_s15 }
  0x12   :  { %s744_s16 = scalar_lea.vmem %s26_s13, 128  ;;  %p749_p6 = scmp.lt.s32.totalorder %s26_s13, %s26_s13 }
  0x13   :  { %p745_p5 = scmp.ne.s32.totalorder %s26_s13, %s744_s16  ;;  %p750_p7 = scmp.lt.s32.totalorder %s744_s16, %s744_s16 }
  0x15   :  { %p751_p8 = por %p750_p7, %p749_p6 }
  0x17   :  { %p752_p9 = pnand %p751_p8, %p745_p5 }
  0x19   :  { %755 = shalt.err (!%p752_p9)
}
  0x1a   :  { %28 = dma.hbm_to_vmem [thread:$0]  %s1179_s0, 128, %s26_s13, [#allocation5]  }
  0x1b   :  { %s764_s19 = scalar_lea.vmem %s47_s15, 512  ;;  %p769_p11 = scmp.lt.s32.totalorder %s47_s15, %s47_s15 }
  0x1c   :  { %p765_p10 = scmp.ne.s32.totalorder %s47_s15, %s764_s19  ;;  %p770_p12 = scmp.lt.s32.totalorder %s764_s19, %s764_s19 }
  0x1e   :  { %p771_p13 = por %p770_p12, %p769_p11 }
  0x20   :  { %p772_p0 = pnand %p771_p13, %p765_p10 }
  0x22   :  { %775 = shalt.err (!%p772_p0)
}
  0x23   :  { %52 = dma.hbm_to_vmem [thread:$0]  %s1181_s2, 512, %s47_s15, [#allocation9], %s835_s30, %s835_s30, %s836_s9  }
  0x24   :  { %s839_s21 = smov [#allocation11]  }
  0x25   :  { %s58_s22 = sshll.u32 %s839_s21, 4  ;;  %s59_s22 = int_to_ptr.vmem [resolvable:$true] %s58_s22 }
  0x26   :  { %s784_s23 = scalar_lea.vmem %s59_s22, 512  ;;  %p789_p2 = scmp.lt.s32.totalorder %s59_s22, %s59_s22 }
  0x27   :  { %p785_p1 = scmp.ne.s32.totalorder %s59_s22, %s784_s23  ;;  %p790_p3 = scmp.lt.s32.totalorder %s784_s23, %s784_s23 }
  0x29   :  { %p791_p4 = por %p790_p3, %p789_p2 }
  0x2b   :  { %p792_p5 = pnand %p791_p4, %p785_p1 }
  0x2d   :  { %795 = shalt.err (!%p792_p5)
}
  0x2e   :  { %64 = dma.hbm_to_vmem [thread:$0]  %s1182_s3, 512, %s59_s22, [#allocation12], %s835_s30, %s835_s30, %s836_s9  }
  0x2f   :  { %824 = dma.done.wait [#allocation5], 128  }
  0x30   :  { %825 = vsyncadd [#allocation5], 4294967168 }
  0x31   :  { %826 = dma.done.wait [#allocation9], 1024  }
  0x32   :  { %827 = vsyncadd [#allocation9], 4294966272 }
  0x33   :  { %828 = dma.done.wait [#allocation12], 512  }
  0x34   :  { %829 = vsyncadd [#allocation12], 4294966784  ;;  %v163_v0 = vld [vmem:[#allocation11 + $0x18] sm:$0xff]  ;;  %v162_v1 = vld [vmem:[#allocation11 + $0x10] sm:$0xff]  ;;  %s840_s2 = smov 96   ;;  %s841_s25 = smov 64  }
  0x35   :  { %175 = vrot.lane.b32.xlu0 %v163_v0, %s840_s2  ;;  %173 = vrot.lane.b32.xlu1 %v162_v1, %s840_s2  ;;  %s842_s26 = smov 32   ;;  %v161_v2 = vld [vmem:[#allocation11 + $0x8] sm:$0xff]  ;;  %v160_v3 = vld [vmem:[#allocation11] sm:$0xff]  ;;  %v925_v4 = vld [vmem:[#allocation10 + $0x10] sm:$0xff]  ;;  %vm108_vm0 = vcmask 261120   ;;  %v950_v24 = vmul.f32 %v162_v1, %v162_v1  ;;  %v955_v28 = vmul.f32 %v163_v0, %v163_v0  ;;  %v843_v56 = vmov 0.0  }
  0x36   :  { %v927_v5 = vld [vmem:[#allocation10 + $0x8] sm:$0xff]  ;;  %v929_v6 = vld [vmem:[#allocation10] sm:$0xff]  ;;  %v100_v7 = vmul.f32 %v162_v1, %v925_v4  ;;  %v934_v10 = vld [vmem:[#allocation8 + $0x10] sm:$0xff]  ;;  %v946_v18 = vmul.f32 %v161_v2, %v161_v2  ;;  %v948_v19 = vmul.f32 %v160_v3, %v160_v3  ;;  %676 = vmatprep.subr.mxu0 %v843_v56  ;;  %vm113_vm1 = vcmask 253952   ;;  %s845_s17 = smov [#allocation13]  }
  0x37   :  { %v99_v8 = vmul.f32 %v161_v2, %v927_v5  ;;  %v98_v9 = vmul.f32 %v160_v3, %v929_v6  ;;  %v936_v11 = vld [vmem:[#allocation8 + $0x8] sm:$0xff]  ;;  %v938_v12 = vld [vmem:[#allocation8] sm:$0xff]  ;;  %v90_v16 = vld [vmem:[#allocation10 + $0x18] sm:$0xff]  ;;  %vm844_vm2 = vmmov 0   ;;  %vm211_vm3 = vcmask 523520   ;;  %s645_s18 = sshll.u32 %s845_s17, 4  ;;  %s646_s18 = int_to_ptr.vmem [resolvable:$true] %s645_s18 }
  0x38   :  { %v104_v13 = vadd.f32 %v100_v7, %v934_v10  ;;  %v101_v17 = vmul.f32 %v163_v0, %v90_v16  ;;  %v86_v20 = vld [vmem:[#allocation8 + $0x18] sm:$0xff]  ;;  %v968_v39 = vld [vmem:[%s1184_s5] sm:$0x1]  ;;  %684 = vmatprep.mubr.msk.f32.mxu0 %vm844_vm2, %v843_v56  ;;  %vm342_vm4 = vcmask 785920   ;;  %vm473_vm5 = vcmask 1048320   ;;  %s796_s19 = scalar_lea.vmem %s646_s18, 128  ;;  %p801_p7 = scmp.lt.s32.totalorder %s646_s18, %s646_s18 }
  0x39   :  { %306 = vrot.lane.b32.xlu0 %v163_v0, %s841_s25  ;;  %437 = vrot.lane.b32.xlu1 %v163_v0, %s842_s26  ;;  %v103_v14 = vadd.f32 %v99_v8, %v936_v11  ;;  %v102_v15 = vadd.f32 %v98_v9, %v938_v12  ;;  %v97_v40 = vld [vmem:[%s1185_s6] sm:$0x1]  ;;  %vm224_vm6 = vcmask 516352   ;;  %vm355_vm7 = vcmask 778752   ;;  %p797_p6 = scmp.ne.s32.totalorder %s646_s18, %s796_s19  ;;  %p802_p8 = scmp.lt.s32.totalorder %s796_s19, %s796_s19 }
  0x3a   :  { %111 = vst.msk [vmem:[#allocation2 + $0x10] sm:$0xff] %vm108_vm0, %v104_v13  ;;  %v105_v23 = vadd.f32 %v101_v17, %v86_v20  ;;  %v117_v25 = vmul.f32 %v104_v13, %v104_v13  ;;  %v106_v41 = vmul.f32 %v97_v40, %v968_v39  ;;  %v977_v44 = vld [vmem:[%s1183_s4] sm:$0x1]  ;;  %v985_v50 = vmul.f32 %v97_v40, %v97_v40 }
  0x3b   :  { %109 = vst.msk [vmem:[#allocation2] sm:$0xff] %vm108_vm0, %v102_v15  ;;  %110 = vst.msk [vmem:[#allocation2 + $0x8] sm:$0xff] %vm108_vm0, %v103_v14  ;;  %v115_v21 = vmul.f32 %v102_v15, %v102_v15  ;;  %v116_v22 = vmul.f32 %v103_v14, %v103_v14  ;;  %vm486_vm8 = vcmask 1041152   ;;  %p803_p9 = por %p802_p8, %p801_p7 }
  0x3c   :  { %112 = vst.msk [vmem:[#allocation2 + $0x18] sm:$0xff] %vm108_vm0, %v105_v23  ;;  %v118_v29 = vmul.f32 %v105_v23, %v105_v23  ;;  %v125_v30 = vsub.f32 %v117_v25, %v950_v24  ;;  %v107_v47 = vadd.f32 %v106_v41, %v977_v44 }
  0x3d   :  { %304 = vrot.lane.b32.xlu0 %v162_v1, %s841_s25  ;;  %171 = vrot.lane.b32.xlu1 %v161_v2, %s840_s2  ;;  %v123_v26 = vsub.f32 %v115_v21, %v948_v19  ;;  %v124_v27 = vsub.f32 %v116_v22, %v946_v18  ;;  %p804_p10 = pnand %p803_p9, %p797_p6 }
  0x3e   :  { %v126_v33 = vsub.f32 %v118_v29, %v955_v28  ;;  %v130_v35 = vsel %vm108_vm0, %v125_v30, 0.0  ;;  %v983_v49 = vmul.f32 %v107_v47, %v107_v47  ;;  %114 = vst.msk [vmem:[#allocation3] sm:$0x1] %vm113_vm1, %v107_v47 }
  0x3f   :  { %v127_v31 = vsel %vm108_vm0, %v123_v26, 0.0  ;;  %v128_v32 = vsel %vm108_vm0, %v124_v27, 0.0 }
  0x40   :  { %v129_v34 = vadd.f32 %v128_v32, %v127_v31  ;;  %v132_v37 = vsel %vm108_vm0, %v126_v33, 0.0  ;;  %v145_v57 = vsub.f32 %v983_v49, %v985_v50 }
  0x41   :  { %435 = vrot.lane.b32.xlu0 %v162_v1, %s842_s26  ;;  %302 = vrot.lane.b32.xlu1 %v161_v2, %s841_s25 }
  0x42   :  { %v131_v36 = vadd.f32 %v130_v35, %v129_v34 }
  0x44   :  { %v963_v38 = vadd.f32 %v132_v37, %v131_v36  ;;  %v217_v37 = vlaneseq }
  0x45   :  { %169 = vrot.lane.b32.xlu0 %v160_v3, %s840_s2  ;;  %433 = vrot.lane.b32.xlu1 %v161_v2, %s842_s26 }
  0x49   :  { %300 = vrot.lane.b32.xlu0 %v160_v3, %s841_s25  ;;  %431 = vrot.lane.b32.xlu1 %v160_v3, %s842_s26 }
  0xa7   :  { %v176_v42 = vpop.permute.xlu0 %175  ;;  %v174_v43 = vpop.permute.xlu1 %173 }
  0xa8   :  { %v184_v45 = vmul.f32 %v176_v42, %v90_v16  ;;  %v183_v46 = vmul.f32 %v174_v43, %v925_v4  ;;  %v218_v42 = vshrl.u32 %v217_v37, 7 }
  0xaa   :  { %v981_v48 = vadd.f32 %v184_v45, %v86_v20  ;;  %v988_v52 = vadd.f32 %v183_v46, %v934_v10  ;;  %v1114_v47 = vsub.s32 0, %v218_v42 }
  0xab   :  { %v307_v51 = vpop.permute.xlu0 %306  ;;  %v438_v53 = vpop.permute.xlu1 %437 }
  0xac   :  { %v315_v54 = vmul.f32 %v307_v51, %v90_v16  ;;  %205 = vrot.lane.b32.xlu0 %v981_v48, %s842_s26  ;;  %v446_v55 = vmul.f32 %v438_v53, %v90_v16 }
  0xae   :  { %v995_v58 = vadd.f32 %v315_v54, %v86_v20  ;;  %v999_v62 = vadd.f32 %v446_v55, %v86_v20 }
  0xaf   :  { %v305_v59 = vpop.permute.xlu0 %304  ;;  %v172_v60 = vpop.permute.xlu1 %171 }
  0xb0   :  { %v314_v61 = vmul.f32 %v305_v59, %v925_v4  ;;  %336 = vrot.lane.b32.xlu1 %v995_v58, %s841_s25  ;;  %203 = vrot.lane.b32.xlu0 %v988_v52, %s842_s26  ;;  %v182_v63 = vmul.f32 %v172_v60, %v927_v5 }
  0xb2   :  { %v1007_v0 = vadd.f32 %v314_v61, %v934_v10  ;;  %v1011_v7 = vadd.f32 %v182_v63, %v936_v11 }
  0xb3   :  { %v436_v1 = vpop.permute.xlu0 %435  ;;  %v303_v2 = vpop.permute.xlu1 %302 }
  0xb4   :  { %v445_v3 = vmul.f32 %v436_v1, %v925_v4  ;;  %467 = vrot.lane.b32.xlu1 %v999_v62, %s840_s2  ;;  %334 = vrot.lane.b32.xlu0 %v1007_v0, %s841_s25  ;;  %v313_v8 = vmul.f32 %v303_v2, %v927_v5  ;;  %v227_v51 = vmul.f32 %v1011_v7, %v1011_v7  ;;  %v553_v1 = vld [vmem:[#allocation4] sm:$0xff] }
  0xb6   :  { %v1019_v9 = vadd.f32 %v445_v3, %v934_v10  ;;  %v1022_v15 = vadd.f32 %v313_v8, %v936_v11 }
  0xb7   :  { %v170_v13 = vpop.permute.xlu0 %169  ;;  %v434_v14 = vpop.permute.xlu1 %433 }
  0xb8   :  { %v181_v4 = vmul.f32 %v170_v13, %v929_v6  ;;  %465 = vrot.lane.b32.xlu0 %v1019_v9, %s840_s2  ;;  %201 = vrot.lane.b32.xlu1 %v1011_v7, %s842_s26  ;;  %v444_v16 = vmul.f32 %v434_v14, %v927_v5 }
  0xba   :  { %v1031_v17 = vadd.f32 %v181_v4, %v938_v12  ;;  %v1034_v21 = vadd.f32 %v444_v16, %v936_v11  ;;  %v164_v11 = vld [vmem:[%s1185_s6] sm:$0x1] }
  0xbb   :  { %v301_v10 = vpop.permute.xlu0 %300  ;;  %v432_v20 = vpop.permute.xlu1 %431  ;;  %v271_v26 = vmul.f32 %v164_v11, %v164_v11 }
  0xbc   :  { %v312_v22 = vmul.f32 %v301_v10, %v929_v6  ;;  %332 = vrot.lane.b32.xlu1 %v1022_v15, %s841_s25  ;;  %199 = vrot.lane.b32.xlu0 %v1031_v17, %s842_s26  ;;  %v443_v23 = vmul.f32 %v432_v20, %v929_v6  ;;  %v295_v6 = vld [vmem:[%s1185_s6] sm:$0x1]  ;;  %v226_v50 = vmul.f32 %v1031_v17, %v1031_v17 }
  0xbd   :  { %v402_v27 = vmul.f32 %v295_v6, %v295_v6 }
  0xbe   :  { %v1043_v5 = vadd.f32 %v312_v22, %v938_v12  ;;  %v1046_v25 = vadd.f32 %v443_v23, %v938_v12  ;;  %v426_v12 = vld [vmem:[%s1185_s6] sm:$0x1]  ;;  %v489_v23 = vmul.f32 %v1034_v21, %v1034_v21 }
  0xc0   :  { %463 = vrot.lane.b32.xlu1 %v1034_v21, %s840_s2  ;;  %330 = vrot.lane.b32.xlu0 %v1043_v5, %s841_s25  ;;  %v357_v13 = vmul.f32 %v1043_v5, %v1043_v5  ;;  %v488_v22 = vmul.f32 %v1046_v25, %v1046_v25 }
  0xc4   :  { %461 = vrot.lane.b32.xlu1 %v1046_v25, %s840_s2  ;;  %190 = vrot.lane.b32.xlu0 %v164_v11, %s840_s2 }
  0xc8   :  { %238 = vrot.lane.b32.xlu1 %v948_v19, %s840_s2  ;;  %240 = vrot.lane.b32.xlu0 %v946_v18, %s840_s2 }
  0xcc   :  { %321 = vrot.lane.b32.xlu1 %v295_v6, %s841_s25  ;;  %369 = vrot.lane.b32.xlu0 %v948_v19, %s841_s25 }
  0xd0   :  { %371 = vrot.lane.b32.xlu1 %v946_v18, %s841_s25  ;;  %452 = vrot.lane.b32.xlu0 %v426_v12, %s842_s26 }
  0xd4   :  { %500 = vrot.lane.b32.xlu1 %v948_v19, %s842_s26  ;;  %502 = vrot.lane.b32.xlu0 %v946_v18, %s842_s26  ;;  %v533_v18 = vmul.f32 %v426_v12, %v426_v12  ;;  %v146_v19 = vsel %vm113_vm1, %v145_v57, 0.0 }
  0xd8   :  { %242 = vrot.lane.b32.xlu1 %v950_v24, %s840_s2  ;;  %373 = vrot.lane.b32.xlu0 %v950_v24, %s841_s25 }
  0xdc   :  { %504 = vrot.lane.b32.xlu1 %v950_v24, %s842_s26  ;;  %244 = vrot.lane.b32.xlu0 %v955_v28, %s840_s2 }
  0xe0   :  { %375 = vrot.lane.b32.xlu1 %v955_v28, %s841_s25  ;;  %506 = vrot.lane.b32.xlu0 %v955_v28, %s842_s26 }
  0xe4   :  { %273 = vrot.lane.b32.xlu1 %v271_v26, %s840_s2  ;;  %404 = vrot.lane.b32.xlu0 %v402_v27, %s841_s25 }
  0xe8   :  { %535 = vrot.lane.b32.xlu1 %v533_v18, %s842_s26  ;;  %v228_v18 = vmul.f32 %v988_v52, %v988_v52 }
 0x103   :  { %134 = vadd.xlane.f32.xlu0 %v963_v38 }
 0x10c   :  { %147 = vadd.xlane.f32.xlu1 %v146_v19  ;;  %v359_v19 = vmul.f32 %v1007_v0, %v1007_v0 }
 0x11e   :  { %v206_v24 = vpop.permute.xlu0 %205 }
 0x11f   :  { %215 = vst.msk [vmem:[#allocation2 + $0x18] sm:$0xff] %vm211_vm3, %v206_v24 }
 0x122   :  { %v337_v28 = vpop.permute.xlu1 %336  ;;  %v204_v29 = vpop.permute.xlu0 %203 }
 0x123   :  { %346 = vst.msk [vmem:[#allocation2 + $0x18] sm:$0xff] %vm342_vm4, %v337_v28 }
 0x124   :  { %214 = vst.msk [vmem:[#allocation2 + $0x10] sm:$0xff] %vm211_vm3, %v204_v29 }
 0x126   :  { %v468_v30 = vpop.permute.xlu1 %467  ;;  %v335_v31 = vpop.permute.xlu0 %334 }
 0x127   :  { %477 = vst.msk [vmem:[#allocation2 + $0x18] sm:$0xff] %vm473_vm5, %v468_v30 }
 0x128   :  { %345 = vst.msk [vmem:[#allocation2 + $0x10] sm:$0xff] %vm342_vm4, %v335_v31 }
 0x12a   :  { %v466_v32 = vpop.permute.xlu0 %465  ;;  %v202_v33 = vpop.permute.xlu1 %201 }
 0x12b   :  { %476 = vst.msk [vmem:[#allocation2 + $0x10] sm:$0xff] %vm473_vm5, %v466_v32  ;;  %v490_v32 = vmul.f32 %v1019_v9, %v1019_v9  ;;  %v491_v9 = vmul.f32 %v999_v62, %v999_v62 }
 0x12c   :  { %213 = vst.msk [vmem:[#allocation2 + $0x8] sm:$0xff] %vm211_vm3, %v202_v33  ;;  %v229_v33 = vmul.f32 %v981_v48, %v981_v48 }
 0x12e   :  { %v333_v34 = vpop.permute.xlu1 %332  ;;  %v200_v35 = vpop.permute.xlu0 %199  ;;  %v557_v36 = vld [vmem:[#allocation2 + $0x18] sm:$0xff] }
 0x12f   :  { %344 = vst.msk [vmem:[#allocation2 + $0x8] sm:$0xff] %vm342_vm4, %v333_v34  ;;  %677 = vmatpush3.msra.mxu0 %v557_v36 }
 0x130   :  { %212 = vst.msk [vmem:[#allocation2] sm:$0xff] %vm211_vm3, %v200_v35  ;;  %678 = vmatprep.subr.mxu0 %v843_v56 }
 0x132   :  { %v464_v38 = vpop.permute.xlu1 %463  ;;  %v331_v40 = vpop.permute.xlu0 %330  ;;  %v556_v41 = vld [vmem:[#allocation2 + $0x10] sm:$0xff] }
 0x133   :  { %475 = vst.msk [vmem:[#allocation2 + $0x8] sm:$0xff] %vm473_vm5, %v464_v38  ;;  %679 = vmatpush3.msra.mxu0 %v556_v41 }
 0x134   :  { %343 = vst.msk [vmem:[#allocation2] sm:$0xff] %vm342_vm4, %v331_v40  ;;  %680 = vmatprep.subr.mxu0 %v843_v56  ;;  %v360_v40 = vmul.f32 %v995_v58, %v995_v58 }
 0x136   :  { %v462_v43 = vpop.permute.xlu1 %461  ;;  %v191_v45 = vpop.permute.xlu0 %190 }
 0x137   :  { %474 = vst.msk [vmem:[#allocation2] sm:$0xff] %vm473_vm5, %v462_v43  ;;  %v193_v46 = vmul.f32 %v191_v45, %v968_v39 }
 0x139   :  { %v1117_v49 = vadd.f32 %v193_v46, %v977_v44 }
 0x13a   :  { %v239_v53 = vpop.permute.xlu1 %238  ;;  %v241_v54 = vpop.permute.xlu0 %240  ;;  %v555_v55 = vld [vmem:[#allocation2 + $0x8] sm:$0xff] }
 0x13b   :  { %v250_v57 = vsub.f32 %v226_v50, %v239_v53  ;;  %v251_v59 = vsub.f32 %v227_v51, %v241_v54  ;;  %681 = vmatpush3.msra.mxu0 %v555_v55  ;;  %v220_v60 = vrot.slane %v1117_v49, %v1114_v47 }
 0x13c   :  { %682 = vmatprep.subr.mxu0 %v843_v56  ;;  %v358_v56 = vmul.f32 %v1022_v15, %v1022_v15 }
 0x13d   :  { %v254_v61 = vsel %vm108_vm0, %v250_v57, 0.0  ;;  %v255_v63 = vsel %vm108_vm0, %v251_v59, 0.0  ;;  %221 = vrot.lane.b32.xlu0 %v220_v60, %s842_s26 }
 0x13e   :  { %v256_v2 = vadd.f32 %v255_v63, %v254_v61  ;;  %v322_v3 = vpop.permute.xlu1 %321  ;;  %v370_v7 = vpop.permute.xlu0 %369  ;;  %v554_v8 = vld [vmem:[#allocation2] sm:$0xff] }
 0x13f   :  { %683 = vmatpush3.msra.mxu0 %v554_v8  ;;  %v381_v14 = vsub.f32 %v357_v13, %v370_v7  ;;  %v324_v0 = vmul.f32 %v322_v3, %v968_v39 }
 0x140   :  { %685 = vmatmul.mubr.msk.f32.vlgmr.msra.gmra.mxu0 %vm108_vm0, %v553_v1 }
 0x141   :  { %v385_v10 = vsel %vm108_vm0, %v381_v14, 0.0  ;;  %v325_v51 = vadd.f32 %v324_v0, %v977_v44 }
 0x142   :  { %v372_v4 = vpop.permute.xlu1 %371  ;;  %v453_v16 = vpop.permute.xlu0 %452 }
 0x143   :  { %v382_v17 = vsub.f32 %v358_v56, %v372_v4  ;;  %v455_v41 = vmul.f32 %v453_v16, %v968_v39  ;;  %v270_v39 = vmul.f32 %v1117_v49, %v1117_v49  ;;  %v401_v1 = vmul.f32 %v325_v51, %v325_v51 }
 0x144   :  { %v351_v14 = vrot.slane %v325_v51, %v1114_v47 }
 0x145   :  { %v386_v20 = vsel %vm108_vm0, %v382_v17, 0.0  ;;  %v456_v55 = vadd.f32 %v455_v41, %v977_v44 }
 0x146   :  { %v387_v5 = vadd.f32 %v386_v20, %v385_v10  ;;  %v501_v11 = vpop.permute.xlu1 %500  ;;  %v503_v6 = vpop.permute.xlu0 %502 }
 0x147   :  { %v512_v12 = vsub.f32 %v488_v22, %v501_v11  ;;  %v513_v26 = vsub.f32 %v489_v23, %v503_v6  ;;  %v532_v3 = vmul.f32 %v456_v55, %v456_v55  ;;  %v482_v56 = vrot.slane %v456_v55, %v1114_v47 }
 0x149   :  { %v516_v15 = vsel %vm108_vm0, %v512_v12, 0.0  ;;  %v517_v27 = vsel %vm108_vm0, %v513_v26, 0.0 }
 0x14a   :  { %v518_v24 = vadd.f32 %v517_v27, %v516_v15  ;;  %v243_v25 = vpop.permute.xlu1 %242  ;;  %v374_v28 = vpop.permute.xlu0 %373 }
 0x14b   :  { %v252_v29 = vsub.f32 %v228_v18, %v243_v25  ;;  %v383_v21 = vsub.f32 %v359_v19, %v374_v28 }
 0x14d   :  { %v257_v30 = vsel %vm108_vm0, %v252_v29, 0.0  ;;  %v388_v31 = vsel %vm108_vm0, %v383_v21, 0.0 }
 0x14e   :  { %v505_v34 = vpop.permute.xlu1 %504  ;;  %v245_v52 = vpop.permute.xlu0 %244  ;;  %v258_v35 = vadd.f32 %v257_v30, %v256_v2  ;;  %v389_v36 = vadd.f32 %v388_v31, %v387_v5 }
 0x14f   :  { %v514_v37 = vsub.f32 %v490_v32, %v505_v34  ;;  %v253_v38 = vsub.f32 %v229_v33, %v245_v52 }
 0x151   :  { %v519_v42 = vsel %vm108_vm0, %v514_v37, 0.0  ;;  %v259_v48 = vsel %vm108_vm0, %v253_v38, 0.0 }
 0x152   :  { %v376_v43 = vpop.permute.xlu1 %375  ;;  %v507_v45 = vpop.permute.xlu0 %506  ;;  %v260_v46 = vadd.f32 %v259_v48, %v258_v35  ;;  %v520_v50 = vadd.f32 %v519_v42, %v518_v24 }
 0x153   :  { %v384_v53 = vsub.f32 %v360_v40, %v376_v43  ;;  %v515_v54 = vsub.f32 %v491_v9, %v507_v45 }
 0x155   :  { %v390_v58 = vsel %vm108_vm0, %v384_v53, 0.0  ;;  %v521_v57 = vsel %vm108_vm0, %v515_v54, 0.0 }
 0x156   :  { %v274_v62 = vpop.permute.xlu1 %273  ;;  %v405_v59 = vpop.permute.xlu0 %404  ;;  %v391_v60 = vadd.f32 %v390_v58, %v389_v36  ;;  %v522_v61 = vadd.f32 %v521_v57, %v520_v50 }
 0x157   :  { %v276_v63 = vsub.f32 %v270_v39, %v274_v62  ;;  %v407_v2 = vsub.f32 %v401_v1, %v405_v59 }
 0x159   :  { %v277_v7 = vsel %vm113_vm1, %v276_v63, 0.0  ;;  %v408_v13 = vsel %vm113_vm1, %v407_v2, 0.0 }
 0x15a   :  { %v536_v8 = vpop.permute.xlu1 %535  ;;  %278 = vadd.xlane.f32.xlu1 %v277_v7 }
 0x15b   :  { %v538_v44 = vsub.f32 %v532_v3, %v536_v8 }
 0x15d   :  { %v539_v49 = vsel %vm113_vm1, %v538_v44, 0.0 }
 0x15e   :  { %409 = vadd.xlane.f32.xlu1 %v408_v13  ;;  %540 = vadd.xlane.f32.xlu0 %v539_v49 }
 0x162   :  { %261 = vadd.xlane.f32.xlu1 %v260_v46 }
 0x166   :  { %392 = vadd.xlane.f32.xlu1 %v391_v60 }
 0x16a   :  { %523 = vadd.xlane.f32.xlu1 %v522_v61 }
 0x17b   :  { %352 = vrot.lane.b32.xlu1 %v351_v14, %s841_s25 }
 0x17f   :  { %483 = vrot.lane.b32.xlu1 %v482_v56, %s840_s2 }
 0x18c   :  { %v135_v4 = vpop.xlane.xlu0 %134 }
 0x18d   :  { %v136_v16 = vrot.slane %v135_v4, 4 }
 0x18f   :  { %v137_v17 = vadd.f32 %v136_v16, %v135_v4 }
 0x191   :  { %v138_v10 = vrot.slane %v137_v17, 2 }
 0x193   :  { %v139_v20 = vadd.f32 %v138_v10, %v137_v17 }
 0x195   :  { %v148_v22 = vpop.xlane.xlu1 %147  ;;  %v140_v23 = vrot.slane %v139_v20, 1 }
 0x196   :  { %v149_v5 = vrot.slane %v148_v22, 4 }
 0x197   :  { %v141_v11 = vadd.f32 %v140_v23, %v139_v20 }
 0x198   :  { %v150_v6 = vadd.f32 %v149_v5, %v148_v22 }
 0x199   :  { %687 = vpush %v141_v11 }
 0x19a   :  { %v151_v12 = vrot.slane %v150_v6, 2 }
 0x19c   :  { %v152_v26 = vadd.f32 %v151_v12, %v150_v6 }
 0x19e   :  { %v153_v15 = vrot.slane %v152_v26, 1 }
 0x1a0   :  { %v154_v27 = vadd.f32 %v153_v15, %v152_v26 }
 0x1a2   :  { %689 = vpush %v154_v27 }
 0x1af   :  { %v222_v47 = vpop.permute.xlu0 %221 }
 0x1b0   :  { %225 = vst.msk [vmem:[#allocation3] sm:$0x1] %vm224_vm6, %v222_v47 }
 0x1ca   :  { %s688_s6 = spop %687 }
 0x1d3   :  { %s690_s14 = spop %689 }
 0x1d4   :  { %s156_s15 = sadd.f32 %s690_s14, %s688_s6 }
 0x1d6   :  { %s157_s16 = smul.f32 0.5, %s156_s15 }
 0x1d8   :  { %159 = sst [smem:[#allocation14]] %s157_s16 }
 0x1e3   :  { %v279_v18 = vpop.xlane.xlu1 %278 }
 0x1e4   :  { %v280_v19 = vrot.slane %v279_v18, 4 }
 0x1e6   :  { %v281_v24 = vadd.f32 %v280_v19, %v279_v18 }
 0x1e7   :  { %v410_v25 = vpop.xlane.xlu1 %409  ;;  %v541_v29 = vpop.xlane.xlu0 %540 }
 0x1e8   :  { %v411_v28 = vrot.slane %v410_v25, 4  ;;  %v282_v21 = vrot.slane %v281_v24, 2  ;;  %v542_v31 = vrot.slane %v541_v29, 4 }
 0x1ea   :  { %v412_v30 = vadd.f32 %v411_v28, %v410_v25  ;;  %v543_v35 = vadd.f32 %v542_v31, %v541_v29  ;;  %v283_v0 = vadd.f32 %v282_v21, %v281_v24 }
 0x1eb   :  { %v262_v32 = vpop.xlane.xlu1 %261 }
 0x1ec   :  { %v263_v33 = vrot.slane %v262_v32, 4  ;;  %v413_v52 = vrot.slane %v412_v30, 2  ;;  %v544_v42 = vrot.slane %v543_v35, 2  ;;  %v284_v48 = vrot.slane %v283_v0, 1 }
 0x1ee   :  { %v264_v34 = vadd.f32 %v263_v33, %v262_v32  ;;  %v414_v43 = vadd.f32 %v413_v52, %v412_v30  ;;  %v545_v55 = vadd.f32 %v544_v42, %v543_v35  ;;  %v285_v58 = vadd.f32 %v284_v48, %v283_v0 }
 0x1ef   :  { %v393_v36 = vpop.xlane.xlu1 %392 }
 0x1f0   :  { %v265_v37 = vrot.slane %v264_v34, 2  ;;  %v394_v38 = vrot.slane %v393_v36, 4  ;;  %v415_v57 = vrot.slane %v414_v43, 1  ;;  %v546_v2 = vrot.slane %v545_v55, 1 }
 0x1f2   :  { %v395_v40 = vadd.f32 %v394_v38, %v393_v36  ;;  %v266_v41 = vadd.f32 %v265_v37, %v264_v34  ;;  %v416_v1 = vadd.f32 %v415_v57, %v414_v43  ;;  %v547_v8 = vadd.f32 %v546_v2, %v545_v55 }
 0x1f3   :  { %v524_v9 = vpop.xlane.xlu1 %523 }
 0x1f4   :  { %v396_v45 = vrot.slane %v395_v40, 2  ;;  %v525_v46 = vrot.slane %v524_v9, 4  ;;  %v267_v50 = vrot.slane %v266_v41, 1 }
 0x1f6   :  { %v526_v51 = vadd.f32 %v525_v46, %v524_v9  ;;  %v268_v53 = vadd.f32 %v267_v50, %v266_v41  ;;  %v397_v54 = vadd.f32 %v396_v45, %v395_v40 }
 0x1f7   :  { %v353_v39 = vpop.permute.xlu1 %352 }
 0x1f8   :  { %v527_v62 = vrot.slane %v526_v51, 2  ;;  %356 = vst.msk [vmem:[#allocation3] sm:$0x1] %vm355_vm7, %v353_v39  ;;  %v398_v59 = vrot.slane %v397_v54, 1 }
 0x1f9   :  { %691 = vpush %v268_v53 }
 0x1fa   :  { %693 = vpush %v285_v58  ;;  %v399_v60 = vadd.f32 %v398_v59, %v397_v54  ;;  %v528_v61 = vadd.f32 %v527_v62, %v526_v51 }
 0x1fb   :  { %v484_v63 = vpop.permute.xlu1 %483 }
 0x1fc   :  { %487 = vst.msk [vmem:[#allocation3] sm:$0x1] %vm486_vm8, %v484_v63  ;;  %v529_v3 = vrot.slane %v528_v61, 1 }
 0x1fd   :  { %695 = vpush %v399_v60 }
 0x1fe   :  { %697 = vpush %v416_v1  ;;  %v530_v7 = vadd.f32 %v529_v3, %v528_v61 }
 0x200   :  { %699 = vpush %v530_v7  ;;  %v634_v44 = vpop.f32.mrf.mxu0 }
 0x201   :  { %701 = vpush %v547_v8 }
 0x202   :  { %v686_v13 = vpop.f32.mrf.mxu0 }
 0x203   :  { %v669_v49 = vld [vmem:[#allocation3] ss:$0 sm:$0xff] }
 0x204   :  { %v635_v14 = vadd.f32 %v669_v49, %v634_v44 }
 0x206   :  { %638 = vst [vmem:[#allocation13] sm:$0xff] %v635_v14 }
 0x207   :  { %807 = shalt.err (!%p804_p10)
}
 0x208   :  { %648 = dma.vmem_to_hbm [thread:$0]  %s646_s18, 128, %s1186_s7, [#allocation6]  }
 0x209   :  { %s846_s30 = smov [#allocation14]  }
 0x22a   :  { %s692_s21 = spop %691 }
 0x22b   :  { %s694_s22 = spop %693 }
 0x22c   :  { %s287_s23 = sadd.f32 %s694_s22, %s692_s21 }
 0x22e   :  { %s288_s0 = smul.f32 0.5, %s287_s23  ;;  %s696_s24 = spop %695 }
 0x22f   :  { %s698_s2 = spop %697 }
 0x230   :  { %290 = sst [smem:[#allocation14 + $0x1]] %s288_s0 }
 0x231   :  { %s418_s25 = sadd.f32 %s698_s2, %s696_s24  ;;  %s700_s26 = spop %699 }
 0x232   :  { %s702_s27 = spop %701 }
 0x233   :  { %s419_s3 = smul.f32 0.5, %s418_s25  ;;  %s549_s28 = sadd.f32 %s702_s27, %s700_s26 }
 0x235   :  { %421 = sst [smem:[#allocation14 + $0x2]] %s419_s3  ;;  %s550_s29 = smul.f32 0.5, %s549_s28 }
 0x237   :  { %552 = sst [smem:[#allocation14 + $0x3]] %s550_s29 }
 0x238   :  { %656 = dma.smem_to_hbm %s846_s30, 16, %s1187_s8, [#allocation7]  }
 0x239   :  { %830 = dma.done.wait [#allocation6], 128  }
 0x23a   :  { %831 = vsyncadd [#allocation6], 4294967168 }
 0x23b   :  { %832 = dma.done.wait [#allocation7], 16  }
 0x23c   :  { %833 = vsyncadd [#allocation7], 4294967280 }
 0x23d   :  { %663 = sfence }
 0x23e   :  { %664 = vsyncpa [#allocation5], 1 }
 0x23f   :  { %665 = vsyncpa [#allocation9], 1 }
 0x240   :  { %666 = vsyncpa [#allocation12], 1 }
 0x241   :  { %667 = vsyncpa [#allocation6], 1 }
 0x242   :  { %668 = vsyncpa [#allocation7], 1 }

</bundles_post_ra>
